<compile_context>
chip_gen: v7x
topology: tpu7x:2x2x1
jax: 0.10.0
libtpu: 0.0.40
codegen_flags: <defaults>
</compile_context>

<pallas_src>
import functools

import jax
import jax.numpy as jnp
from jax import lax
from jax.experimental import pallas as pl
from jax.experimental.pallas import tpu as pltpu


def _toeplitz_weights(w, in_w, out_w, shift):
    """Fold the (kw, ci) conv taps into block-Toeplitz matmul weights.

    w: (K, K, Cin, Cout) HWIO cross-correlation weights.
    Returns T of shape (K, in_w*Cin, out_w*Cout) with
        T[kh, wi*Cin + ci, wo*Cout + co] = w[kh, wi - wo + shift, ci, co]
    when 0 <= wi - wo + shift < K, else 0.  Out-of-range input columns
    contribute nothing, so zero padding along W is implicit.
    """
    K, _, Cin, Cout = w.shape
    wi = jnp.arange(in_w)[:, None]
    wo = jnp.arange(out_w)[None, :]
    kw = wi - wo + shift                                    # (in_w, out_w)
    valid = (kw >= 0) & (kw < K)
    kw_c = jnp.clip(kw, 0, K - 1)
    t = w[:, kw_c, :, :]                                    # (K, in_w, out_w, Cin, Cout)
    t = t * valid[None, :, :, None, None].astype(w.dtype)
    t = jnp.transpose(t, (0, 1, 3, 2, 4))                   # (K, in_w, Cin, out_w, Cout)
    return t.reshape(K, in_w * Cin, out_w * Cout)


def prepare_resblock_params(w1, b1, w2, b2, W):
    """Build the lane-dense kernel parameters ONCE (cache at setup time).

    w*: (K, K, C, C) HWIO cross-correlation weights; b*: (C,).
    Returns (t1cat, b1t, t2cat, b2t) with Toeplitz weights already in bf16
    (contraction depth K*W*C) and biases tiled over width in f32.
    """
    K, _, C, _ = w1.shape
    p = (K - 1) // 2
    WC = W * C
    t1 = _toeplitz_weights(w1.astype(jnp.float32), W, W, p)        # (K, WC, WC)
    t2 = _toeplitz_weights(w2.astype(jnp.float32), W, W, p)        # (K, WC, WC)
    t1cat = t1.reshape(K * WC, WC).astype(jnp.bfloat16)            # (K*WC, WC)
    t2cat = t2.reshape(K * WC, WC).astype(jnp.bfloat16)
    b1t = jnp.tile(b1.astype(jnp.float32), W).reshape(1, WC)
    b2t = jnp.tile(b2.astype(jnp.float32), W).reshape(1, WC)
    return t1cat, b1t, t2cat, b2t


def _resblock_kernel(xpad_ref, t1_ref, b1_ref, t2_ref, b2_ref, out_ref,
                     *, H, W, C, K, B_blk, res_scale):
    """One grid step = B_blk images, lane-dense (rows, W*C) slabs.

    xpad_ref : (B_blk, H+4p, W*C) f32   H-padded input slab
    t1_ref   : (K*W*C, W*C)       bf16  conv1 block-Toeplitz weights (im2col RHS)
    b1_ref   : (1, W*C)           f32   conv1 bias tiled over width
    t2_ref   : (K*W*C, W*C)       bf16  conv2 block-Toeplitz weights
    b2_ref   : (1, W*C)           f32   conv2 bias tiled over width
    out_ref  : (B_blk, H, W*C)    f32   output slab
    """
    p = (K - 1) // 2
    Hh = H + 2 * p
    WC = W * C

    # ---- conv1: single MXU matmul, contraction depth K*W*C, all images stacked
    # along the M (sublane) axis.  The K row-shifted windows of each image are
    # concatenated along lanes (im2col), cast to bf16 for the MXU.
    xcols = []
    for b in range(B_blk):
        xcols.append(jnp.concatenate(
            [xpad_ref[b, kh:kh + Hh, :].astype(jnp.bfloat16) for kh in range(K)],
            axis=1))
    xcol = xcols[0] if B_blk == 1 else jnp.concatenate(xcols, axis=0)   # (B*Hh, K*WC)

    acc1 = jnp.dot(xcol, t1_ref[...],
                   preferred_element_type=jnp.float32)                  # (B*Hh, WC)

    # Bias + ReLU, then zero the p halo rows of each image's Hh-row grid so
    # they act as conv2's implicit H zero padding (one row-mask vmul).
    rows = lax.broadcasted_iota(jnp.int32, (Hh, 1), 0)
    rowmask = ((rows >= p) & (rows < p + H)).astype(jnp.float32)        # (Hh, 1)
    if B_blk > 1:
        rowmask = jnp.concatenate([rowmask] * B_blk, axis=0)
    h = jnp.maximum(acc1 + b1_ref[...], 0.0) * rowmask                  # (B*Hh, WC)

    # ---- conv2: same single-matmul im2col on h (W zero-padding is implicit in t2).
    hb = h.astype(jnp.bfloat16)
    hcols = []
    for b in range(B_blk):
        base = b * Hh
        hcols.append(jnp.concatenate(
            [hb[base + kh:base + kh + H, :] for kh in range(K)], axis=1))
    hcol = hcols[0] if B_blk == 1 else jnp.concatenate(hcols, axis=0)   # (B*H, K*WC)

    acc2 = jnp.dot(hcol, t2_ref[...],
                   preferred_element_type=jnp.float32)                  # (B*H, WC)

    res = acc2 + b2_ref[...]
    if res_scale != 1.0:               # skip the full-slab vmul in the common case
        res = res * res_scale

    # ---- residual add + lane-dense (unmasked, 128-wide) store, per image.
    for b in range(B_blk):
        x_center = xpad_ref[b, 2 * p:2 * p + H, :]                      # f32
        out_ref[b] = (res[b * H:(b + 1) * H, :] + x_center).astype(out_ref.dtype)


def resblock_lane_dense(xpad, t1cat, b1t, t2cat, b2t, *, H, W, C, K,
                        res_scale=1.0, images_per_step=None):
    """Lane-dense entry point.  xpad: (N, H+4p, W*C) f32, rows zero-padded by 2p."""
    N = xpad.shape[0]
    p = (K - 1) // 2
    WC = W * C

    if images_per_step is None:
        # >= 2 grid steps when possible so both v7x TensorCores get work; on
        # 1-TC chips (v5e/v6e) pass images_per_step=N for a single fat step.
        images_per_step = N // 2 if (N >= 2 and N % 2 == 0) else 1
    B = images_per_step
    assert N % B == 0, (N, B)

    kernel = functools.partial(_resblock_kernel, H=H, W=W, C=C, K=K,
                               B_blk=B, res_scale=float(res_scale))

    return pl.pallas_call(
        kernel,
        out_shape=jax.ShapeDtypeStruct((N, H, WC), jnp.float32),
        grid_spec=pltpu.PrefetchScalarGridSpec(
            num_scalar_prefetch=0,
            grid=(N // B,),
            in_specs=[
                pl.BlockSpec((B, H + 4 * p, WC), lambda n: (n, 0, 0)),
                pl.BlockSpec((K * WC, WC), lambda n: (0, 0)),
                pl.BlockSpec((1, WC), lambda n: (0, 0)),
                pl.BlockSpec((K * WC, WC), lambda n: (0, 0)),
                pl.BlockSpec((1, WC), lambda n: (0, 0)),
            ],
            out_specs=pl.BlockSpec((B, H, WC), lambda n: (n, 0, 0)),
        ),
        compiler_params=pltpu.CompilerParams(
            dimension_semantics=("parallel",)),
    )(xpad, t1cat, b1t, t2cat, b2t)


def resblock_pallas(x_nchw, t1cat, b1t, t2cat, b2t, *, res_scale=1.0,
                    images_per_step=None):
    """NCHW convenience wrapper (layout plumbing around the lane-dense kernel).

    For stacks of ResBlocks keep activations in the (N, H, W*C) layout and call
    resblock_lane_dense directly to avoid per-block HBM transpose passes.
    """
    N, C, H, W = x_nchw.shape
    WC = W * C
    K = t1cat.shape[0] // WC
    p = (K - 1) // 2

    # NCHW -> lane-dense (N, H, W*C); only the row axis is zero-padded (by 2p),
    # W padding is folded into the Toeplitz weights.
    x2 = jnp.transpose(x_nchw, (0, 2, 3, 1)).astype(jnp.float32).reshape(N, H, WC)
    xpad = jnp.pad(x2, ((0, 0), (2 * p, 2 * p), (0, 0)))

    out2 = resblock_lane_dense(xpad, t1cat, b1t, t2cat, b2t, H=H, W=W, C=C, K=K,
                               res_scale=res_scale, images_per_step=images_per_step)
    return jnp.transpose(out2.reshape(N, H, W, C), (0, 3, 1, 2))


def resblock_reference(x_nchw, w1, b1, w2, b2, *, res_scale=1.0):
    """Pure-JAX f32 reference (same semantics as the PyTorch module)."""
    x = jnp.transpose(x_nchw, (0, 2, 3, 1))
    dn = ("NHWC", "HWIO", "NHWC")
    h = lax.conv_general_dilated(x, w1, (1, 1), "SAME",
                                 dimension_numbers=dn) + b1
    h = jnp.maximum(h, 0.0)
    r = lax.conv_general_dilated(h, w2, (1, 1), "SAME",
                                 dimension_numbers=dn) + b2
    out = r * res_scale + x
    return jnp.transpose(out, (0, 3, 1, 2))


if __name__ == "__main__":
    # Small shapes consistent with ResBlock(conv, n_feats=8, kernel_size=3);
    # W*C = 128 so every slab is exactly one lane-tile wide.
    N, C, H, W, K = 2, 8, 16, 16, 3
    res_scale = 1.0

    key = jax.random.PRNGKey(0)
    kx, kw1, kb1, kw2, kb2 = jax.random.split(key, 5)

    x = jax.random.normal(kx, (N, C, H, W), dtype=jnp.float32)
    w1 = jax.random.normal(kw1, (K, K, C, C), dtype=jnp.float32) * 0.1
    b1 = jax.random.normal(kb1, (C,), dtype=jnp.float32) * 0.1
    w2 = jax.random.normal(kw2, (K, K, C, C), dtype=jnp.float32) * 0.1
    b2 = jax.random.normal(kb2, (C,), dtype=jnp.float32) * 0.1

    # Toeplitz weights / tiled biases prepared once at parameter-setup time.
    params = prepare_resblock_params(w1, b1, w2, b2, W)

    run = jax.jit(functools.partial(resblock_pallas, res_scale=res_scale))
    out = jax.block_until_ready(run(x, *params))

    ref = resblock_reference(x, w1, b1, w2, b2, res_scale=res_scale)
    assert out.shape == (N, C, H, W)
    max_err = float(jnp.max(jnp.abs(out - ref)))
    # bf16 MXU operands (f32 accumulation): tolerance loosened vs f32 per review.
    assert jnp.allclose(out, ref, atol=5e-2, rtol=5e-2), max_err

    print("KERNEL_OK")
</pallas_src>

<mosaic_0001>
module attributes {stable_mosaic.version = 11 : i64} {
  func.func @_resblock_kernel(%arg0: i32, %arg1: memref<1x20x128xf32, #tpu.memory_space<vmem>>, %arg2: memref<384x128xbf16, #tpu.memory_space<vmem>>, %arg3: memref<1x128xf32, #tpu.memory_space<vmem>>, %arg4: memref<384x128xbf16, #tpu.memory_space<vmem>>, %arg5: memref<1x128xf32, #tpu.memory_space<vmem>>, %arg6: memref<1x16x128xf32, #tpu.memory_space<vmem>>) attributes {dimension_semantics = [#tpu.dimension_semantics<parallel>], iteration_bounds = array<i64: 2>, scalar_prefetch = 0 : i64, scratch_operands = 0 : i64, tpu.core_type = #tpu.core_type<tc>, window_params = [{transform_indices = @transform_0, window_bounds = array<i64: 1, 20, 128>}, {pipeline_mode = #tpu.pipeline_mode<synchronous>, transform_indices = @transform_1, window_bounds = array<i64: 384, 128>}, {pipeline_mode = #tpu.pipeline_mode<synchronous>, transform_indices = @transform_2, window_bounds = array<i64: 1, 128>}, {pipeline_mode = #tpu.pipeline_mode<synchronous>, transform_indices = @transform_3, window_bounds = array<i64: 384, 128>}, {pipeline_mode = #tpu.pipeline_mode<synchronous>, transform_indices = @transform_4, window_bounds = array<i64: 1, 128>}, {transform_indices = @transform_5, window_bounds = array<i64: 1, 16, 128>}]} {
    %c0 = arith.constant 0 : index
    %c0_0 = arith.constant 0 : index
    %c0_1 = arith.constant 0 : index
    %0 = vector.load %arg1[%c0, %c0_0, %c0_1] : memref<1x20x128xf32, #tpu.memory_space<vmem>>, vector<1x18x128xf32>
    %1 = vector.shape_cast %0 : vector<1x18x128xf32> to vector<18x128xf32>
    %2 = arith.truncf %1 : vector<18x128xf32> to vector<18x128xbf16>
    %c0_2 = arith.constant 0 : index
    %c1 = arith.constant 1 : index
    %c0_3 = arith.constant 0 : index
    %3 = vector.load %arg1[%c0_2, %c1, %c0_3] : memref<1x20x128xf32, #tpu.memory_space<vmem>>, vector<1x18x128xf32>
    %4 = vector.shape_cast %3 : vector<1x18x128xf32> to vector<18x128xf32>
    %5 = arith.truncf %4 : vector<18x128xf32> to vector<18x128xbf16>
    %c0_4 = arith.constant 0 : index
    %c2 = arith.constant 2 : index
    %c0_5 = arith.constant 0 : index
    %6 = vector.load %arg1[%c0_4, %c2, %c0_5] : memref<1x20x128xf32, #tpu.memory_space<vmem>>, vector<1x18x128xf32>
    %7 = vector.shape_cast %6 : vector<1x18x128xf32> to vector<18x128xf32>
    %8 = arith.truncf %7 : vector<18x128xf32> to vector<18x128xbf16>
    %9 = tpu.concatenate %2, %5, %8 in 1 : vector<18x128xbf16>, vector<18x128xbf16>, vector<18x128xbf16> -> vector<18x384xbf16>
    %c0_6 = arith.constant 0 : index
    %c0_7 = arith.constant 0 : index
    %10 = vector.load %arg2[%c0_6, %c0_7] : memref<384x128xbf16, #tpu.memory_space<vmem>>, vector<384x128xbf16>
    %cst = arith.constant dense<0.000000e+00> : vector<18x128xf32>
    %11 = tpu.matmul %9, %10, %cst {dimension_numbers = #tpu.dot_dimension_numbers<[1], [0], [0], [1], [0, 0, 1, 1], [], []>} : vector<18x384xbf16>, vector<384x128xbf16>, vector<18x128xf32> -> vector<18x128xf32>
    %12 = tpu.iota {dimensions = array<i32: 0>} : vector<18x1xi32>
    %c1_i32 = arith.constant 1 : i32
    %13 = vector.broadcast %c1_i32 : i32 to vector<18x1xi32>
    %14 = arith.cmpi sge, %12, %13 : vector<18x1xi32>
    %c17_i32 = arith.constant 17 : i32
    %15 = vector.broadcast %c17_i32 : i32 to vector<18x1xi32>
    %16 = arith.cmpi slt, %12, %15 : vector<18x1xi32>
    %17 = arith.andi %14, %16 : vector<18x1xi1>
    %18 = arith.extui %17 : vector<18x1xi1> to vector<18x1xi32>
    %19 = arith.sitofp %18 : vector<18x1xi32> to vector<18x1xf32>
    %c0_8 = arith.constant 0 : index
    %c0_9 = arith.constant 0 : index
    %20 = vector.load %arg3[%c0_8, %c0_9] : memref<1x128xf32, #tpu.memory_space<vmem>>, vector<1x128xf32>
    %21 = vector.broadcast %20 : vector<1x128xf32> to vector<18x128xf32>
    %22 = arith.addf %11, %21 : vector<18x128xf32>
    %cst_10 = arith.constant 0.000000e+00 : f32
    %23 = vector.broadcast %cst_10 : f32 to vector<18x128xf32>
    %24 = arith.maximumf %22, %23 : vector<18x128xf32>
    %25 = vector.broadcast %19 : vector<18x1xf32> to vector<18x128xf32>
    %26 = arith.mulf %24, %25 : vector<18x128xf32>
    %27 = arith.truncf %26 : vector<18x128xf32> to vector<18x128xbf16>
    %28 = vector.extract_strided_slice %27 {offsets = [0, 0], sizes = [16, 128], strides = [1, 1]} : vector<18x128xbf16> to vector<16x128xbf16>
    %29 = vector.extract_strided_slice %27 {offsets = [1, 0], sizes = [16, 128], strides = [1, 1]} : vector<18x128xbf16> to vector<16x128xbf16>
    %30 = vector.extract_strided_slice %27 {offsets = [2, 0], sizes = [16, 128], strides = [1, 1]} : vector<18x128xbf16> to vector<16x128xbf16>
    %31 = tpu.concatenate %28, %29, %30 in 1 : vector<16x128xbf16>, vector<16x128xbf16>, vector<16x128xbf16> -> vector<16x384xbf16>
    %c0_11 = arith.constant 0 : index
    %c0_12 = arith.constant 0 : index
    %32 = vector.load %arg4[%c0_11, %c0_12] : memref<384x128xbf16, #tpu.memory_space<vmem>>, vector<384x128xbf16>
    %cst_13 = arith.constant dense<0.000000e+00> : vector<16x128xf32>
    %33 = tpu.matmul %31, %32, %cst_13 {dimension_numbers = #tpu.dot_dimension_numbers<[1], [0], [0], [1], [0, 0, 1, 1], [], []>} : vector<16x384xbf16>, vector<384x128xbf16>, vector<16x128xf32> -> vector<16x128xf32>
    %c0_14 = arith.constant 0 : index
    %c0_15 = arith.constant 0 : index
    %34 = vector.load %arg5[%c0_14, %c0_15] : memref<1x128xf32, #tpu.memory_space<vmem>>, vector<1x128xf32>
    %35 = vector.broadcast %34 : vector<1x128xf32> to vector<16x128xf32>
    %36 = arith.addf %33, %35 : vector<16x128xf32>
    %c0_16 = arith.constant 0 : index
    %c2_17 = arith.constant 2 : index
    %c0_18 = arith.constant 0 : index
    %37 = vector.load %arg1[%c0_16, %c2_17, %c0_18] : memref<1x20x128xf32, #tpu.memory_space<vmem>>, vector<1x16x128xf32>
    %38 = vector.shape_cast %37 : vector<1x16x128xf32> to vector<16x128xf32>
    %39 = arith.addf %36, %38 : vector<16x128xf32>
    %c0_19 = arith.constant 0 : index
    %c0_20 = arith.constant 0 : index
    %c0_21 = arith.constant 0 : index
    %40 = vector.load %arg6[%c0_19, %c0_20, %c0_21] : memref<1x16x128xf32, #tpu.memory_space<vmem>>, vector<1x16x128xf32>
    %41 = vector.shape_cast %40 : vector<1x16x128xf32> to vector<16x128xf32>
    %42 = vector.shape_cast %39 : vector<16x128xf32> to vector<1x16x128xf32>
    tpu.vector_store %arg6[%c0_19, %c0_20, %c0_21], %42 {strides = array<i32>} : memref<1x16x128xf32, #tpu.memory_space<vmem>>, vector<1x16x128xf32>,
    return
  }
  func.func @transform_0(%arg0: i32) -> (i32, i32, i32) {
    %c0_i32 = arith.constant 0 : i32
    %c0_i32_0 = arith.constant 0 : i32
    %c0_i32_1 = arith.constant 0 : i32
    return %arg0, %c0_i32, %c0_i32_0 : i32, i32, i32
  }
  func.func @transform_1(%arg0: i32) -> (i32, i32) {
    %c0_i32 = arith.constant 0 : i32
    %c0_i32_0 = arith.constant 0 : i32
    %c0_i32_1 = arith.constant 0 : i32
    return %c0_i32, %c0_i32_0 : i32, i32
  }
  func.func @transform_2(%arg0: i32) -> (i32, i32) {
    %c0_i32 = arith.constant 0 : i32
    %c0_i32_0 = arith.constant 0 : i32
    %c0_i32_1 = arith.constant 0 : i32
    return %c0_i32, %c0_i32_0 : i32, i32
  }
  func.func @transform_3(%arg0: i32) -> (i32, i32) {
    %c0_i32 = arith.constant 0 : i32
    %c0_i32_0 = arith.constant 0 : i32
    %c0_i32_1 = arith.constant 0 : i32
    return %c0_i32, %c0_i32_0 : i32, i32
  }
  func.func @transform_4(%arg0: i32) -> (i32, i32) {
    %c0_i32 = arith.constant 0 : i32
    %c0_i32_0 = arith.constant 0 : i32
    %c0_i32_1 = arith.constant 0 : i32
    return %c0_i32, %c0_i32_0 : i32, i32
  }
  func.func @transform_5(%arg0: i32) -> (i32, i32, i32) {
    %c0_i32 = arith.constant 0 : i32
    %c0_i32_0 = arith.constant 0 : i32
    %c0_i32_1 = arith.constant 0 : i32
    return %arg0, %c0_i32, %c0_i32_0 : i32, i32, i32
  }
}

</mosaic_0001>

<bundles_post_ra>
// kernel: resblock_pallas.1
= control target key start
LH: loop header
LB: loop body
LE: loop exit
PB: predicated region body
PF: predicated region fallthrough
CT: control target
= control target key end

     0   :  { %s1197_s18 = smov 0   ;;  %s1402_s0 = inlined_call_operand.vmem [shape: f32[2,20,128], index: 0, kind: input, shape index: {}]   ;;  %s1403_s1 = inlined_call_operand.vmem [shape: bf16[384,128], index: 1, kind: input, shape index: {}]   ;;  %s1404_s2 = inlined_call_operand.vmem [shape: f32[1,128], index: 2, kind: input, shape index: {}]   ;;  %s1405_s3 = inlined_call_operand.vmem [shape: bf16[384,128], index: 3, kind: input, shape index: {}]   ;;  %s1406_s4 = inlined_call_operand.vmem [shape: f32[1,128], index: 4, kind: input, shape index: {}]   ;;  %s1407_s5 = inlined_call_operand.vmem [shape: f32[2,16,128], index: 5, kind: output, shape index: {}]  }
   0x1 LB: > { %s926_s19 = sadd.s32 4294967295, %s1163_s18   ;;  %p930_p0 = scmp.ge.s32.totalorder %s1163_s18, 1  ;;  %s1163_s18 = sphi %s1197_s18, %s15_s18  }
   0x2   : > { %p187_p1 = scmp.lt.s32.totalorder %s1163_s18, 3 }
   0x4   : > { %p188_p2 = pnand %p930_p0, %p187_p1 }
   0x5   : > { %v1109_v0 = vld [vmem:[%s1403_s1 + $0x40] sm:$0xff] (!%p188_p2)   ;;  %v1111_v2 = vld [vmem:[%s1403_s1 + $0x48] sm:$0xff] (!%p188_p2)   ;;  %v1114_v5 = vld [vmem:[%s1403_s1 + $0x50] sm:$0xff] (!%p188_p2)   ;;  %p215_p3 = scmp.lt.s32.totalorder (!%p188_p2), %s926_s19, 1  ;;  %v1165_v41 = vmov (!%p188_p2), 0.0   ;;  %vm1166_vm0 = vmmov (!%p188_p2), 0  }
   0x6   : > { %191 = sbr.rel (%p188_p2) target bundleno = 501 (0x1f5), region = 40  ;;  %v1110_v1 = vld [vmem:[%s1403_s1] sm:$0xff] (!%p188_p2)   ;;  %989 = vmatprep.subr.bf16.mxu0 (!%p188_p2), %v1109_v0  ;;  %v1113_v4 = vld [vmem:[%s1403_s1 + $0x8] sm:$0xff] (!%p188_p2)   ;;  %v1116_v7 = vld [vmem:[%s1403_s1 + $0x10] sm:$0xff] (!%p188_p2)   ;;  %v289_v0 = vlaneseq (!%p188_p2)  ;;  %vm579_vm3 = vcmask (!%p188_p2), 1046528  }
   0x7   : > { %990 = vmatpush3.bf16.msra.mxu0 (!%p188_p2), %v1110_v1  ;;  %v1112_v3 = vld [vmem:[%s1403_s1 + $0x80] sm:$0xff] (!%p188_p2)   ;;  %v1115_v6 = vld [vmem:[%s1403_s1 + $0x88] sm:$0xff] (!%p188_p2)   ;;  %v1117_v8 = vld [vmem:[%s1403_s1 + $0x58] sm:$0xff] (!%p188_p2)   ;;  %vm563_vm4 = vsmask.f32 (!%p188_p2), 7424 }
   0x8   : > { %991 = vmatprep.subr.bf16.mxu0 (!%p188_p2), %v1111_v2  ;;  %1058 = vmatprep.subr.bf16.mxu1 (!%p188_p2), %v1112_v3  ;;  %v1118_v9 = vld [vmem:[%s1403_s1 + $0x90] sm:$0xff] (!%p188_p2)   ;;  %v1119_v10 = vld [vmem:[%s1403_s1 + $0x18] sm:$0xff] (!%p188_p2)   ;;  %v1120_v11 = vld [vmem:[%s1403_s1 + $0x60] sm:$0xff] (!%p188_p2)   ;;  %v290_v2 = vshrl.u32 (!%p188_p2), %v289_v0, 7 }
   0x9   : > { %1059 = vmatpush3.bf16.msra.mxu1 (!%p188_p2), %v1112_v3  ;;  %v1121_v12 = vld [vmem:[%s1403_s1 + $0x98] sm:$0xff] (!%p188_p2)   ;;  %v1122_v13 = vld [vmem:[%s1403_s1 + $0x20] sm:$0xff] (!%p188_p2)   ;;  %v1123_v15 = vld [vmem:[%s1403_s1 + $0x68] sm:$0xff] (!%p188_p2)  }
   0xa   : > { %1060 = vmatprep.subr.bf16.mxu1 (!%p188_p2), %v1115_v6  ;;  %v1124_v14 = vld [vmem:[%s1403_s1 + $0xa0] sm:$0xff] (!%p188_p2)   ;;  %v1125_v16 = vld [vmem:[%s1403_s1 + $0x28] sm:$0xff] (!%p188_p2)   ;;  %v1126_v18 = vld [vmem:[%s1403_s1 + $0x70] sm:$0xff] (!%p188_p2)   ;;  %vm293_vm1 = vcmp.ge.s32.totalorder (!%p188_p2), %v290_v2, 1 }
   0xb   : > { %992 = vmatpush3.bf16.msra.mxu0 (!%p188_p2), %v1113_v4  ;;  %v1127_v17 = vld [vmem:[%s1403_s1 + $0xa8] sm:$0xff] (!%p188_p2)   ;;  %v1128_v19 = vld [vmem:[%s1403_s1 + $0x30] sm:$0xff] (!%p188_p2)   ;;  %v1129_v23 = vld [vmem:[%s1403_s1 + $0x78] sm:$0xff] (!%p188_p2)  }
   0xc   : > { %993 = vmatprep.subr.bf16.mxu0 (!%p188_p2), %v1114_v5  ;;  %v1130_v20 = vld [vmem:[%s1403_s1 + $0xb0] sm:$0xff] (!%p188_p2)   ;;  %v1131_v25 = vld [vmem:[%s1403_s1 + $0x38] sm:$0xff] (!%p188_p2)   ;;  %v1134_v33 = vld [vmem:[%s1405_s3 + $0x40] sm:$0xff] (!%p188_p2)  }
   0xd   : > { %1061 = vmatpush3.bf16.msra.mxu1 %v1115_v6  ;;  %s1409_s19 = smov (!%p215_p3, %s926_s19), 1  ;;  %v1132_v30 = vld [vmem:[%s1403_s1 + $0xb8] sm:$0xff]   ;;  %v1135_v36 = vld [vmem:[%s1405_s3] sm:$0xff]   ;;  %v1136_v42 = vld [vmem:[%s1405_s3 + $0x88] sm:$0xff]  }
   0xe   : > { %1062 = vmatprep.subr.bf16.mxu1 %v1118_v9  ;;  %s1098_s29 = smul.u32 24, %s1409_s19  ;;  %v1133_v38 = vld [vmem:[%s1405_s3 + $0x80] sm:$0xff]   ;;  %v1137_v44 = vld [vmem:[%s1405_s3 + $0x48] sm:$0xff]   ;;  %v1139_v46 = vld [vmem:[%s1405_s3 + $0x90] sm:$0xff]   ;;  %s988_s7 = sshll.u32 %s1409_s19, 4 }
   0xf   : > { %994 = vmatpush3.bf16.msra.mxu0 %v1116_v7  ;;  %v1138_v45 = vld [vmem:[%s1405_s3 + $0x8] sm:$0xff]   ;;  %v1140_v47 = vld [vmem:[%s1405_s3 + $0x50] sm:$0xff]   ;;  %v1142_v49 = vld [vmem:[%s1405_s3 + $0x98] sm:$0xff]   ;;  %s224_s10 = scalar_lea.vmem %s1407_s5, %s988_s7 }
  0x10   : > { %995 = vmatprep.subr.bf16.mxu0 %v1117_v8  ;;  %s1272_s13 = scalar_lea.vmem %s1402_s0, %s1098_s29  ;;  %v1141_v48 = vld [vmem:[%s1405_s3 + $0x10] sm:$0xff]   ;;  %v1143_v50 = vld [vmem:[%s1405_s3 + $0x58] sm:$0xff]   ;;  %v1145_v52 = vld [vmem:[%s1405_s3 + $0xa0] sm:$0xff]  }
  0x11   : > { %1063 = vmatpush3.bf16.msra.mxu1 %v1118_v9  ;;  %v231_v21 = vld [vmem:[%s1272_s13 + $0x1] sm:$0xff]  ;;  %v232_v22 = vld [vmem:[%s1272_s13 + $0x9] sm:$0xff]  ;;  %v233_v32 = vld [vmem:[%s1272_s13 + $0x11] sm:$0x3] }
  0x12   : > { %1064 = vmatprep.subr.bf16.mxu1 %v1121_v12  ;;  %v234_v24 = vpack.c.bf16 %v232_v22, %v231_v21  ;;  %v1289_v26 = vld [vmem:[%s1272_s13 + $0x2] sm:$0xff]  ;;  %v1292_v27 = vld [vmem:[%s1272_s13 + $0xa] sm:$0xff]  ;;  %v238_v34 = vld [vmem:[%s1272_s13 + $0x12] sm:$0x3]  ;;  %v235_v37 = vpack.c.bf16 %v233_v32, %v233_v32 }
  0x13   : > { %996 = vmatpush3.bf16.msra.mxu0 %v1119_v10  ;;  %v226_v28 = vld [vmem:[%s1272_s13] sm:$0xff]  ;;  %v227_v29 = vld [vmem:[%s1272_s13 + $0x8] sm:$0xff]  ;;  %v239_v31 = vpack.c.bf16 %v1292_v27, %v1289_v26  ;;  %v240_v39 = vpack.c.bf16 %v238_v34, %v238_v34  ;;  %v228_v40 = vld [vmem:[%s1272_s13 + $0x10] sm:$0x3] }
  0x14   : > { %997 = vmatprep.subr.bf16.mxu0 %v1120_v11  ;;  %491 = vmatprep.mubr.bf16.mxu0 %v234_v24  ;;  %v229_v35 = vpack.c.bf16 %v227_v29, %v226_v28  ;;  %v230_v43 = vpack.c.bf16 %v228_v40, %v228_v40  ;;  %v1144_v51 = vld [vmem:[%s1405_s3 + $0x18] sm:$0xff]   ;;  %v1146_v53 = vld [vmem:[%s1405_s3 + $0x60] sm:$0xff]   ;;  %v1148_v55 = vld [vmem:[%s1405_s3 + $0xa8] sm:$0xff]  }
  0x15   : > { %1065 = vmatpush3.bf16.msra.mxu1 %v1121_v12  ;;  %1074 = vmatprep.mubr.bf16.mxu1 %v239_v31  ;;  %v1147_v54 = vld [vmem:[%s1405_s3 + $0x20] sm:$0xff]   ;;  %v1149_v56 = vld [vmem:[%s1405_s3 + $0x68] sm:$0xff]   ;;  %v1151_v58 = vld [vmem:[%s1405_s3 + $0xb0] sm:$0xff]  }
  0x16   : > { %1066 = vmatprep.subr.bf16.mxu1 %v1124_v14  ;;  %v1150_v57 = vld [vmem:[%s1405_s3 + $0x28] sm:$0xff]   ;;  %v1152_v59 = vld [vmem:[%s1405_s3 + $0x70] sm:$0xff]   ;;  %v1154_v61 = vld [vmem:[%s1405_s3 + $0xb8] sm:$0xff]  }
  0x17   : > { %998 = vmatpush3.bf16.msra.mxu0 %v1122_v13  ;;  %v1153_v60 = vld [vmem:[%s1405_s3 + $0x30] sm:$0xff]   ;;  %v1155_v62 = vld [vmem:[%s1405_s3 + $0x78] sm:$0xff]   ;;  %v936_v4 = vld [vmem:[%s1404_s2] ss:$0 sm:$0xff] }
  0x18   : > { %999 = vmatprep.subr.bf16.mxu0 %v1123_v15  ;;  %v1156_v63 = vld [vmem:[%s1405_s3 + $0x38] sm:$0xff]  }
  0x19   : > { %1067 = vmatpush3.bf16.msra.mxu1 %v1124_v14 }
  0x1a   : > { %1068 = vmatprep.subr.bf16.mxu1 %v1127_v17 }
  0x1b   : > { %1000 = vmatpush3.bf16.msra.mxu0 %v1125_v16  ;;  %v934_v16 = vsel %vm293_vm1, 1.0, %v1165_v41 }
  0x1c   : > { %1001 = vmatprep.subr.bf16.mxu0 %v1126_v18 }
  0x1d   : > { %1069 = vmatpush3.bf16.msra.mxu1 %v1127_v17  ;;  %v292_v17 = vadd.s32 16, %v290_v2 }
  0x1e   : > { %1070 = vmatprep.subr.bf16.mxu1 %v1130_v20 }
  0x1f   : > { %1002 = vmatpush3.bf16.msra.mxu0 %v1128_v19  ;;  %vm298_vm2 = vcmp.lt.s32.totalorder %v292_v17, 17 }
  0x20   : > { %1003 = vmatprep.subr.bf16.mxu0 %v1129_v23  ;;  %v935_v32 = vsel %vm298_vm2, 1.0, %v1165_v41 }
  0x21   : > { %1071 = vmatpush3.bf16.msra.mxu1 %v1130_v20 }
  0x22   : > { %1072 = vmatprep.subr.bf16.mxu1 %v1132_v30 }
  0x23   : > { %1004 = vmatpush3.bf16.msra.mxu0 %v1131_v25 }
  0x24   : > { %1027 = vmatprep.subr.bf16.mxu0 %v1134_v33 }
  0x25   : > { %1073 = vmatpush3.bf16.msra.mxu1 %v1132_v30 }
  0x26   : > { %492 = vmatmul.mubr.bf16.vlgmr.msra.gmra.mrb[0].mxu0 %v229_v35  ;;  %1078 = vmatprep.subr.bf16.mxu1 %v1165_v41 }
  0x27   : > { %499 = vmatprep.mubr.bf16.mxu0 %v235_v37  ;;  %1028 = vmatpush3.bf16.msra.mxu0 %v1135_v36 }
  0x28   : > { %1075 = vmatmul.mubr.bf16.vlgmr.msra.gmra.mrb[0].mxu1 %v240_v39  ;;  %1029 = vmatprep.subr.bf16.mxu0 %v1137_v44 }
  0x29   : > { %1079 = vmatpush3.bf16.msra.mxu1 %v1133_v38  ;;  %1094 = vmatprep.mubr.msk.bf16.mxu1 %vm1166_vm0, %v1165_v41 }
  0x2a   : > { %1080 = vmatprep.subr.bf16.mxu1 %v1165_v41 }
  0x2b   : > { %1030 = vmatpush3.bf16.msra.mxu0 %v1138_v45 }
  0x2c   : > { %1031 = vmatprep.subr.bf16.mxu0 %v1140_v47 }
  0x2d   : > { %1081 = vmatpush3.bf16.msra.mxu1 %v1136_v42 }
  0x2e   : > { %500 = vmatmul.mubr.bf16.gmra.mrb[4].mxu0 %v230_v43  ;;  %1082 = vmatprep.subr.bf16.mxu1 %v1165_v41 }
  0x2f   : > { %1032 = vmatpush3.bf16.msra.mxu0 %v1141_v48 }
  0x30   : > { %1033 = vmatprep.subr.bf16.mxu0 %v1143_v50 }
  0x31   : > { %1083 = vmatpush3.bf16.msra.mxu1 %v1139_v46 }
  0x32   : > { %1084 = vmatprep.subr.bf16.mxu1 %v1165_v41 }
  0x33   : > { %1034 = vmatpush3.bf16.msra.mxu0 %v1144_v51  ;;  %v961_v51 = vld [vmem:[%s1406_s4] ss:$0 sm:$0xff] }
  0x34   : > { %1035 = vmatprep.subr.bf16.mxu0 %v1146_v53 }
  0x35   : > { %1085 = vmatpush3.bf16.msra.mxu1 %v1142_v49 }
  0x36   : > { %1086 = vmatprep.subr.bf16.mxu1 %v1165_v41 }
  0x37   : > { %1036 = vmatpush3.bf16.msra.mxu0 %v1147_v54 }
  0x38   : > { %1037 = vmatprep.subr.bf16.mxu0 %v1149_v56 }
  0x39   : > { %1087 = vmatpush3.bf16.msra.mxu1 %v1145_v52 }
  0x3a   : > { %1088 = vmatprep.subr.bf16.mxu1 %v1165_v41 }
  0x3b   : > { %1038 = vmatpush3.bf16.msra.mxu0 %v1150_v57 }
  0x3c   : > { %1039 = vmatprep.subr.bf16.mxu0 %v1152_v59 }
  0x3d   : > { %1089 = vmatpush3.bf16.msra.mxu1 %v1148_v55 }
  0x3e   : > { %1090 = vmatprep.subr.bf16.mxu1 %v1165_v41 }
  0x3f   : > { %1040 = vmatpush3.bf16.msra.mxu0 %v1153_v60 }
  0x40   : > { %1041 = vmatprep.subr.bf16.mxu0 %v1155_v62 }
  0x41   : > { %1091 = vmatpush3.bf16.msra.mxu1 %v1151_v58 }
  0x42   : > { %1092 = vmatprep.subr.bf16.mxu1 %v1165_v41 }
  0x43   : > { %1042 = vmatpush3.bf16.msra.mxu0 %v1156_v63 }
  0x45   : > { %1093 = vmatpush3.bf16.msra.mxu1 %v1154_v61 }
  0xf9   : > { %v1005_v1 = vpop.f32.mrb[0].mxu0 }
  0xfa   : > { %v1006_v3 = vpop.f32.mrb[1].mxu0 }
  0xfb   : > { %v1007_v5 = vadd.f32 %v1006_v3, %v1005_v1  ;;  %v1008_v6 = vpop.f32.mrb[2].mxu0  ;;  %v1076_v8 = vpop.f32.mrb[0].mxu1 }
  0xfc   : > { %v1009_v7 = vpop.f32.mrb[3].mxu0  ;;  %v541_v11 = vpop.f32.mrb[1].mxu1 }
  0xfd   : > { %v1010_v9 = vadd.f32 %v1009_v7, %v1008_v6  ;;  %v494_v10 = vadd.f32 %v1007_v5, %v936_v4  ;;  %v1077_v12 = vpop.f32.mrb[2].mxu1 }
  0xfe   : > { %v544_v15 = vpop.f32.mrb[3].mxu1 }
  0xff   : > { %v542_v13 = vadd.f32 %v541_v11, %v494_v10  ;;  %v497_v14 = vadd.f32 %v1010_v9, %v936_v4 }
 0x101   : > { %v555_v18 = vmax.f32 %v542_v13, 0.0  ;;  %v545_v19 = vadd.f32 %v544_v15, %v497_v14  ;;  %v1011_v20 = vpop.f32.mrb[4].mxu0 }
 0x102   : > { %v1012_v21 = vpop.f32.mrb[5].mxu0 }
 0x103   : > { %v558_v22 = vmul.f32 %v934_v16, %v555_v18  ;;  %v556_v23 = vmax.f32 %v545_v19, 0.0  ;;  %v1013_v24 = vadd.f32 %v1012_v21, %v1011_v20  ;;  %v1014_v25 = vpop.f32.mrb[6].mxu0 }
 0x104   : > { %v1015_v28 = vpop.f32.mrb[7].mxu0 }
 0x105   : > { %v561_v29 = vpack.c.bf16 %v556_v23, %v558_v22  ;;  %v502_v30 = vadd.f32 %v1013_v24, %v936_v4 }
 0x107   : > { %v550_v31 = vadd.f32 %v1076_v8, %v502_v30  ;;  %v567_v34 = vshll.u32 %v561_v29, 16  ;;  %v580_v38 = vrot.slane %v561_v29, 1  ;;  %v565_v40 = vshrl.u32 %v561_v29, 16 }
 0x109   : > { %v557_v33 = vmax.f32 %v550_v31, 0.0  ;;  %v569_v37 = vrot.slane %v567_v34, 1 }
 0x10b   : > { %v560_v35 = vmul.f32 %v935_v32, %v557_v33  ;;  %v570_v44 = vor.u32 %v569_v37, %v565_v40 }
 0x10d   : > { %v562_v36 = vpack.c.bf16 %v560_v35, %v560_v35 }
 0x10f   : > { %v581_v39 = vrot.slane %v562_v36, 1  ;;  %v572_v42 = vshll.u32 %v562_v36, 16 }
 0x111   : > { %v582_v43 = vsel %vm579_vm3, %v580_v38, %v581_v39  ;;  %v574_v45 = vrot.slane %v572_v42, 1 }
 0x112   : > { %1095 = vmatmul.mubr.bf16.vlgmr.msra.gmra.mrb[4].mxu1 %v582_v43 }
 0x113   : > { %v575_v46 = vsel %vm563_vm4, %v570_v44, %v574_v45 }
 0x114   : > { %815 = vmatprep.mubr.bf16.mxu0 %v575_v46 }
 0x115   : > { %816 = vmatmul.mubr.bf16.vlgmr.msra.gmra.mrb[8].mxu0 %v561_v29 }
 0x1e5   : > { %v858_v41 = vpop.f32.mrb[4].mxu1 }
 0x1e6   : > { %v1096_v47 = vpop.f32.mrb[5].mxu1 }
 0x1e7   : > { %v861_v48 = vpop.f32.mrb[6].mxu1 }
 0x1e8   : > { %v1043_v49 = vpop.f32.mrb[8].mxu0  ;;  %v1097_v50 = vpop.f32.mrb[7].mxu1 }
 0x1e9   : > { %v1044_v52 = vpop.f32.mrb[9].mxu0 }
 0x1ea   : > { %v1045_v53 = vadd.f32 %v1044_v52, %v1043_v49  ;;  %v1046_v54 = vpop.f32.mrb[10].mxu0 }
 0x1eb   : > { %v1047_v55 = vpop.f32.mrb[11].mxu0 }
 0x1ec   : > { %v818_v56 = vadd.f32 %v1045_v53, %v961_v51  ;;  %v1048_v57 = vadd.f32 %v1047_v55, %v1046_v54 }
 0x1ee   : > { %v859_v58 = vadd.f32 %v858_v41, %v818_v56  ;;  %v821_v59 = vadd.f32 %v1048_v57, %v961_v51 }
 0x1f0   : > { %v867_v60 = vadd.f32 %v859_v58, %v1289_v26  ;;  %v862_v61 = vadd.f32 %v861_v48, %v821_v59 }
 0x1f2   : > { %869 = vst [vmem:[%s224_s10] sm:$0xff] %v867_v60  ;;  %v868_v62 = vadd.f32 %v862_v61, %v1292_v27 }
 0x1f4   : > { %870 = vst [vmem:[%s224_s10 + $0x8] sm:$0xff] %v868_v62 }
 0x1f5 PF: > { %s15_s18 = sadd.s32 1, %s1163_s18  }
 0x1f6   : > { %p12_p4 = scmp.ge.s32.totalorder %s15_s18, 4  }
 0x1f8   :  { %14 = sbr.rel (!%p12_p4) target bundleno = 1 (0x1), region = 70 }

</bundles_post_ra>
